<compile_context>
chip_gen: v6e
topology: v6e:2x2x1
jax: 0.10.0
libtpu: 0.0.40
codegen_flags: <defaults>
</compile_context>

<pallas_src>
import jax
import jax.numpy as jnp
from jax.experimental import pallas as pl
from jax.experimental.pallas import tpu as pltpu


def lstm_cell_kernel(x_ref, h_ref, c_ref, w_ref, b_ref, hc_out_ref):
    H = c_ref.shape[-1]

    # Single fused gate pre-activation matmul on the MXU:
    #   gates (B, 4H) = [x | h_prev] @ [Wx ; Wh] + b
    xh = jnp.concatenate([x_ref[...], h_ref[...]], axis=-1)          # (B, I+H)
    gates = (jnp.dot(xh, w_ref[...], preferred_element_type=jnp.float32)
             + b_ref[...])                                           # (B, 4H)

    # Full-vreg nonlinearities + lane-mask select: one sigmoid and one tanh
    # over the whole (B, 4H) tile instead of four 32-lane sub-tile calls.
    lane = jax.lax.broadcasted_iota(jnp.int32, gates.shape, 1)
    g_mask = (lane >= 2 * H) & (lane < 3 * H)
    act = jnp.where(g_mask, jnp.tanh(gates), jax.nn.sigmoid(gates))

    i_t = act[:, 0 * H:1 * H]
    f_t = act[:, 1 * H:2 * H]
    g_t = act[:, 2 * H:3 * H]
    o_t = act[:, 3 * H:4 * H]

    c_next = f_t * c_ref[...] + i_t * g_t
    h_next = o_t * jnp.tanh(c_next)

    # Single lane-denser output slab [h | c] of shape (B, 2H).
    hc_out_ref[...] = jnp.concatenate([h_next, c_next],
                                      axis=-1).astype(hc_out_ref.dtype)


def verbose_lstm_forward(x, h_prev, c_prev, w_stacked, b):
    """Single LSTM-cell step. Returns (h_next, (h_next, c_next)) like PyTorch.

    w_stacked: (I+H, 4H) = [Wx ; Wh] with gate order [i|f|g|o] along 4H.
    b:         (1, 4H)   = concat of the four gate biases.
    """
    B, H = h_prev.shape
    vmem_spec = pl.BlockSpec(memory_space=pltpu.MemorySpace.VMEM)
    hc = pl.pallas_call(
        lstm_cell_kernel,
        out_shape=jax.ShapeDtypeStruct((B, 2 * H), jnp.float32),
        in_specs=[vmem_spec] * 5,
        out_specs=vmem_spec,
    )(x, h_prev, c_prev, w_stacked, b)
    h_next = hc[:, :H]
    c_next = hc[:, H:]
    return h_next, (h_next, c_next)


def pack_lstm_params(W_ii, W_hi, b_i, W_if, W_hf, b_f,
                     W_ig, W_hg, b_g, W_io, W_ho, b_o):
    """Pack the 12 PyTorch-layout parameters into the fused kernel layout."""
    Wx = jnp.concatenate([W_ii.T, W_if.T, W_ig.T, W_io.T], axis=1)   # (I, 4H)
    Wh = jnp.concatenate([W_hi.T, W_hf.T, W_hg.T, W_ho.T], axis=1)   # (H, 4H)
    w_stacked = jnp.concatenate([Wx, Wh], axis=0)                    # (I+H, 4H)
    b = jnp.concatenate([b_i, b_f, b_g, b_o])[None, :]               # (1, 4H)
    return w_stacked, b


def xavier_uniform(key, shape):
    # PyTorch xavier_uniform_ for a (fan_out, fan_in) matrix.
    fan_out, fan_in = shape
    a = (6.0 / (fan_in + fan_out)) ** 0.5
    return jax.random.uniform(key, shape, jnp.float32, minval=-a, maxval=a)


def reference_forward(x, h_prev, c_prev, params):
    W_ii, W_hi, b_i, W_if, W_hf, b_f, W_ig, W_hg, b_g, W_io, W_ho, b_o = params
    i_t = jax.nn.sigmoid(x @ W_ii.T + h_prev @ W_hi.T + b_i)
    f_t = jax.nn.sigmoid(x @ W_if.T + h_prev @ W_hf.T + b_f)
    g_t = jnp.tanh(x @ W_ig.T + h_prev @ W_hg.T + b_g)
    o_t = jax.nn.sigmoid(x @ W_io.T + h_prev @ W_ho.T + b_o)
    c_next = f_t * c_prev + i_t * g_t
    h_next = o_t * jnp.tanh(c_next)
    return h_next, c_next


if __name__ == "__main__":
    input_size = 16
    hidden_size = 32
    batch = 8

    key = jax.random.PRNGKey(0)
    keys = jax.random.split(key, 16)

    # Parameters. Matrices use xavier-uniform like the module's reset_parameters.
    # Biases are NONZERO here so the bias-broadcast path is actually verified
    # (the module itself zero-inits them; semantics are identical either way).
    W_ii = xavier_uniform(keys[0], (hidden_size, input_size))
    W_hi = xavier_uniform(keys[1], (hidden_size, hidden_size))
    b_i = 0.1 * jax.random.normal(keys[11], (hidden_size,), jnp.float32)
    W_if = xavier_uniform(keys[2], (hidden_size, input_size))
    W_hf = xavier_uniform(keys[3], (hidden_size, hidden_size))
    b_f = 0.1 * jax.random.normal(keys[12], (hidden_size,), jnp.float32)
    W_ig = xavier_uniform(keys[4], (hidden_size, input_size))
    W_hg = xavier_uniform(keys[5], (hidden_size, hidden_size))
    b_g = 0.1 * jax.random.normal(keys[13], (hidden_size,), jnp.float32)
    W_io = xavier_uniform(keys[6], (hidden_size, input_size))
    W_ho = xavier_uniform(keys[7], (hidden_size, hidden_size))
    b_o = 0.1 * jax.random.normal(keys[14], (hidden_size,), jnp.float32)

    # Inputs.
    x = jax.random.normal(keys[8], (batch, input_size), jnp.float32)
    h_prev = jax.random.normal(keys[9], (batch, hidden_size), jnp.float32)
    c_prev = jax.random.normal(keys[10], (batch, hidden_size), jnp.float32)

    # Pack weights for the fused single-matmul kernel.
    w_stacked, b = pack_lstm_params(W_ii, W_hi, b_i, W_if, W_hf, b_f,
                                    W_ig, W_hg, b_g, W_io, W_ho, b_o)

    h_next, (h_same, c_next) = verbose_lstm_forward(x, h_prev, c_prev,
                                                    w_stacked, b)
    jax.block_until_ready((h_next, c_next))

    # Correctness check against a pure-JAX reference of the PyTorch semantics.
    params = (W_ii, W_hi, b_i, W_if, W_hf, b_f, W_ig, W_hg, b_g, W_io, W_ho, b_o)
    h_ref, c_ref = reference_forward(x, h_prev, c_prev, params)
    assert jnp.allclose(h_next, h_ref, atol=1e-5, rtol=1e-5)
    assert jnp.allclose(c_next, c_ref, atol=1e-5, rtol=1e-5)
    assert jnp.array_equal(h_next, h_same)

    print("KERNEL_OK")
</pallas_src>

<mosaic_0001>
module attributes {stable_mosaic.version = 11 : i64} {
  func.func @lstm_cell_kernel(%arg0: memref<8x16xf32, #tpu.memory_space<vmem>>, %arg1: memref<8x32xf32, #tpu.memory_space<vmem>>, %arg2: memref<8x32xf32, #tpu.memory_space<vmem>>, %arg3: memref<48x128xf32, #tpu.memory_space<vmem>>, %arg4: memref<1x128xf32, #tpu.memory_space<vmem>>, %arg5: memref<8x64xf32, #tpu.memory_space<vmem>>) attributes {dimension_semantics = [], scalar_prefetch = 0 : i64, scratch_operands = 0 : i64, tpu.core_type = #tpu.core_type<tc>} {
    %c0 = arith.constant 0 : index
    %c0_0 = arith.constant 0 : index
    %0 = vector.load %arg0[%c0, %c0_0] : memref<8x16xf32, #tpu.memory_space<vmem>>, vector<8x16xf32>
    %c0_1 = arith.constant 0 : index
    %c0_2 = arith.constant 0 : index
    %1 = vector.load %arg1[%c0_1, %c0_2] : memref<8x32xf32, #tpu.memory_space<vmem>>, vector<8x32xf32>
    %2 = tpu.concatenate %0, %1 in 1 : vector<8x16xf32>, vector<8x32xf32> -> vector<8x48xf32>
    %c0_3 = arith.constant 0 : index
    %c0_4 = arith.constant 0 : index
    %3 = vector.load %arg3[%c0_3, %c0_4] : memref<48x128xf32, #tpu.memory_space<vmem>>, vector<48x128xf32>
    %cst = arith.constant dense<0.000000e+00> : vector<8x128xf32>
    %4 = tpu.matmul %2, %3, %cst {dimension_numbers = #tpu.dot_dimension_numbers<[1], [0], [0], [1], [0, 0, 1, 1], [], []>} : vector<8x48xf32>, vector<48x128xf32>, vector<8x128xf32> -> vector<8x128xf32>
    %c0_5 = arith.constant 0 : index
    %c0_6 = arith.constant 0 : index
    %5 = vector.load %arg4[%c0_5, %c0_6] : memref<1x128xf32, #tpu.memory_space<vmem>>, vector<1x128xf32>
    %6 = vector.broadcast %5 : vector<1x128xf32> to vector<8x128xf32>
    %7 = arith.addf %4, %6 : vector<8x128xf32>
    %8 = tpu.iota {dimensions = array<i32: 1>} : vector<8x128xi32>
    %c64_i32 = arith.constant 64 : i32
    %9 = vector.broadcast %c64_i32 : i32 to vector<8x128xi32>
    %10 = arith.cmpi sge, %8, %9 : vector<8x128xi32>
    %c96_i32 = arith.constant 96 : i32
    %11 = vector.broadcast %c96_i32 : i32 to vector<8x128xi32>
    %12 = arith.cmpi slt, %8, %11 : vector<8x128xi32>
    %13 = arith.andi %10, %12 : vector<8x128xi1>
    %14 = math.tanh %7 : vector<8x128xf32>
    %15 = arith.negf %7 : vector<8x128xf32>
    %16 = math.exp %15 : vector<8x128xf32>
    %cst_7 = arith.constant 1.000000e+00 : f32
    %17 = vector.broadcast %cst_7 : f32 to vector<8x128xf32>
    %18 = arith.addf %17, %16 : vector<8x128xf32>
    %19 = arith.divf %17, %18 : vector<8x128xf32>
    %20 = arith.select %13, %14, %19 : vector<8x128xi1>, vector<8x128xf32>
    %21 = vector.extract_strided_slice %20 {offsets = [0, 0], sizes = [8, 32], strides = [1, 1]} : vector<8x128xf32> to vector<8x32xf32>
    %22 = vector.extract_strided_slice %20 {offsets = [0, 32], sizes = [8, 32], strides = [1, 1]} : vector<8x128xf32> to vector<8x32xf32>
    %23 = vector.extract_strided_slice %20 {offsets = [0, 64], sizes = [8, 32], strides = [1, 1]} : vector<8x128xf32> to vector<8x32xf32>
    %24 = vector.extract_strided_slice %20 {offsets = [0, 96], sizes = [8, 32], strides = [1, 1]} : vector<8x128xf32> to vector<8x32xf32>
    %c0_8 = arith.constant 0 : index
    %c0_9 = arith.constant 0 : index
    %25 = vector.load %arg2[%c0_8, %c0_9] : memref<8x32xf32, #tpu.memory_space<vmem>>, vector<8x32xf32>
    %26 = arith.mulf %22, %25 : vector<8x32xf32>
    %27 = arith.mulf %21, %23 : vector<8x32xf32>
    %28 = arith.addf %26, %27 : vector<8x32xf32>
    %29 = math.tanh %28 : vector<8x32xf32>
    %30 = arith.mulf %24, %29 : vector<8x32xf32>
    %31 = tpu.concatenate %30, %28 in 1 : vector<8x32xf32>, vector<8x32xf32> -> vector<8x64xf32>
    %c0_10 = arith.constant 0 : index
    %c0_11 = arith.constant 0 : index
    %32 = vector.load %arg5[%c0_10, %c0_11] : memref<8x64xf32, #tpu.memory_space<vmem>>, vector<8x64xf32>
    tpu.vector_store %arg5[%c0_10, %c0_11], %31 {strides = array<i32>} : memref<8x64xf32, #tpu.memory_space<vmem>>, vector<8x64xf32>,
    return
  }
}

</mosaic_0001>

<bundles_post_ra>
// kernel: tpu_custom_call.1
= control target key start
LH: loop header
LB: loop body
LE: loop exit
PB: predicated region body
PF: predicated region fallthrough
CT: control target
= control target key end

     0   :  { %10 = vsyncpa [#allocation3], 0  ;;  %s441_s0 = inlined_call_operand.hbm [shape: f32[8,16], index: 0, kind: input, shape index: {}]   ;;  %s442_s1 = inlined_call_operand.hbm [shape: f32[8,32], index: 1, kind: input, shape index: {}]   ;;  %s443_s2 = inlined_call_operand.hbm [shape: f32[8,32], index: 2, kind: input, shape index: {}]   ;;  %s444_s3 = inlined_call_operand.hbm [shape: f32[48,128], index: 3, kind: input, shape index: {}]   ;;  %s445_s4 = inlined_call_operand.vmem [shape: f32[1,128], index: 4, kind: input, shape index: {}]   ;;  %s446_s5 = inlined_call_operand.hbm [shape: f32[8,64], index: 5, kind: output, shape index: {}]  }
   0x1   :  { %11 = vsyncpa [#allocation6], 0 }
   0x2   :  { %12 = vsyncpa [#allocation9], 0 }
   0x3   :  { %13 = vsyncpa [#allocation4], 0  ;;  %s378_s18 = smov [#allocation5]   ;;  %s379_s20 = smov [#allocation2]  }
   0x4   :  { %s30_s19 = sshll.u32 %s378_s18, 4  ;;  %s20_s21 = sshll.u32 %s379_s20, 4  ;;  %s31_s19 = int_to_ptr.vmem [resolvable:$true] %s30_s19  ;;  %s21_s21 = int_to_ptr.vmem [resolvable:$true] %s20_s21 }
   0x5   :  { %s278_s22 = scalar_lea.vmem %s31_s19, 128  ;;  %p283_p1 = scmp.lt.s32.totalorder %s31_s19, %s31_s19 }
   0x6   :  { %p279_p0 = scmp.ne.s32.totalorder %s31_s19, %s278_s22  ;;  %p284_p2 = scmp.lt.s32.totalorder %s278_s22, %s278_s22 }
   0x8   :  { %p285_p3 = por %p284_p2, %p283_p1 }
   0xa   :  { %p286_p4 = pnand %p285_p3, %p279_p0 }
   0xc   :  { %289 = shalt.err (!%p286_p4)
}
   0xd   :  { %33 = dma.hbm_to_vmem [thread:$0]  %s442_s1, 128, %s31_s19, [#allocation6]  }
   0xe   :  { %s298_s25 = scalar_lea.vmem %s21_s21, 128  ;;  %p303_p6 = scmp.lt.s32.totalorder %s21_s21, %s21_s21 }
   0xf   :  { %p299_p5 = scmp.ne.s32.totalorder %s21_s21, %s298_s25  ;;  %p304_p7 = scmp.lt.s32.totalorder %s298_s25, %s298_s25 }
  0x11   :  { %p305_p8 = por %p304_p7, %p303_p6 }
  0x13   :  { %p306_p9 = pnand %p305_p8, %p299_p5 }
  0x15   :  { %309 = shalt.err (!%p306_p9)
}
  0x16   :  { %23 = dma.hbm_to_vmem [thread:$0]  %s441_s0, 128, %s21_s21, [#allocation3]  }
  0x17   :  { %s380_s28 = smov [#allocation7]   ;;  %s381_s30 = smov [#allocation8]  }
  0x18   :  { %s40_s29 = sshll.u32 %s380_s28, 4  ;;  %s49_s6 = sshll.u32 %s381_s30, 4  ;;  %s41_s29 = int_to_ptr.vmem [resolvable:$true] %s40_s29  ;;  %s50_s6 = int_to_ptr.vmem [resolvable:$true] %s49_s6 }
  0x19   :  { %s318_s7 = scalar_lea.vmem %s41_s29, 128  ;;  %p323_p11 = scmp.lt.s32.totalorder %s41_s29, %s41_s29 }
  0x1a   :  { %p319_p10 = scmp.ne.s32.totalorder %s41_s29, %s318_s7  ;;  %p324_p12 = scmp.lt.s32.totalorder %s318_s7, %s318_s7 }
  0x1c   :  { %p325_p13 = por %p324_p12, %p323_p11 }
  0x1e   :  { %p326_p0 = pnand %p325_p13, %p319_p10 }
  0x20   :  { %329 = shalt.err (!%p326_p0)
}
  0x21   :  { %43 = dma.hbm_to_vmem [thread:$0]  %s443_s2, 128, %s41_s29, [#allocation6]  }
  0x22   :  { %s338_s9 = scalar_lea.vmem %s50_s6, 768  ;;  %p343_p2 = scmp.lt.s32.totalorder %s50_s6, %s50_s6 }
  0x23   :  { %p339_p1 = scmp.ne.s32.totalorder %s50_s6, %s338_s9  ;;  %p344_p3 = scmp.lt.s32.totalorder %s338_s9, %s338_s9 }
  0x25   :  { %p345_p4 = por %p344_p3, %p343_p2 }
  0x27   :  { %p346_p5 = pnand %p345_p4, %p339_p1 }
  0x29   :  { %349 = shalt.err (!%p346_p5)
}
  0x2a   :  { %s382_s0 = smov 128   ;;  %s383_s10 = smov 8  }
  0x2b   :  { %55 = dma.hbm_to_vmem [thread:$0]  %s444_s3, 768, %s50_s6, [#allocation9], %s382_s0, %s382_s0, %s383_s10  }
  0x2c   :  { %370 = dma.done.wait [#allocation3], 128  }
  0x2d   :  { %371 = vsyncadd [#allocation3], 4294967168 }
  0x2e   :  { %372 = dma.done.wait [#allocation6], 256  }
  0x2f   :  { %373 = vsyncadd [#allocation6], 4294967040 }
  0x30   :  { %374 = dma.done.wait [#allocation9], 768  }
  0x31   :  { %375 = vsyncadd [#allocation9], 4294966528  ;;  %v384_v0 = vmov 0.0   ;;  %vm385_vm0 = vmmov 0   ;;  %v71_v1 = vld [vmem:[#allocation5] sm:$0xff]  ;;  %v83_v2 = vld [vmem:[#allocation8 + $0x28] sm:$0xff]  ;;  %v165_v19 = vlaneseq }
  0x32   :  { %235 = vmatprep.subr.mxu0 %v384_v0  ;;  %247 = vmatprep.mubr.msk.f32.mxu0 %vm385_vm0, %v384_v0  ;;  %v82_v3 = vld [vmem:[#allocation8 + $0x20] sm:$0xff]  ;;  %s386_s2 = smov 16   ;;  %v81_v4 = vld [vmem:[#allocation8 + $0x18] sm:$0xff]  ;;  %s387_s3 = smov 32   ;;  %v80_v6 = vld [vmem:[#allocation8 + $0x10] sm:$0xff]  ;;  %vm76_vm1 = vcmask 130048  }
  0x33   :  { %73 = vrot.lane.b32.xlu0 %v71_v1, %s386_s2  ;;  %236 = vmatpush3.msra.mxu0 %v83_v2  ;;  %v178_v5 = vld [vmem:[#allocation7] sm:$0xff]  ;;  %v79_v7 = vld [vmem:[#allocation8 + $0x8] sm:$0xff]  ;;  %v78_v8 = vld [vmem:[#allocation8] sm:$0xff]  ;;  %vm91_vm2 = vcmask 392192   ;;  %v166_v20 = vand.u32 127, %v165_v19  ;;  %s388_s15 = smov 64  }
  0x34   :  { %237 = vmatprep.subr.mxu0 %v384_v0  ;;  %180 = vrot.lane.b32.xlu1 %v178_v5, %s387_s3  ;;  %v70_v9 = vld [vmem:[#allocation2] sm:$0xff]  ;;  %vm204_vm6 = vcmask 261120   ;;  %vm206_vm7 = vcmask 523264  }
  0x35   :  { %238 = vmatpush3.msra.mxu0 %v82_v3  ;;  %v225_v12 = vld [vmem:[%s445_s4] ss:$0 sm:$0xff]  ;;  %vm167_vm3 = vcmp.ge.s32.totalorder %v166_v20, 64  ;;  %vm168_vm4 = vcmp.lt.s32.totalorder %v166_v20, 96  ;;  %s389_s4 = smov [#allocation10]  }
  0x36   :  { %239 = vmatprep.subr.mxu0 %v384_v0  ;;  %vm169_vm5 = vmand %vm167_vm3, %vm168_vm4  ;;  %s214_s16 = sshll.u32 %s389_s4, 4  ;;  %s215_s16 = int_to_ptr.vmem [resolvable:$true] %s214_s16 }
  0x37   :  { %240 = vmatpush3.msra.mxu0 %v81_v4  ;;  %s350_s17 = scalar_lea.vmem %s215_s16, 128  ;;  %p355_p7 = scmp.lt.s32.totalorder %s215_s16, %s215_s16 }
  0x38   :  { %241 = vmatprep.subr.mxu0 %v384_v0  ;;  %p351_p6 = scmp.ne.s32.totalorder %s215_s16, %s350_s17  ;;  %p356_p8 = scmp.lt.s32.totalorder %s350_s17, %s350_s17 }
  0x39   :  { %242 = vmatpush3.msra.mxu0 %v80_v6 }
  0x3a   :  { %243 = vmatprep.subr.mxu0 %v384_v0  ;;  %p357_p9 = por %p356_p8, %p355_p7 }
  0x3b   :  { %244 = vmatpush3.msra.mxu0 %v79_v7 }
  0x3c   :  { %245 = vmatprep.subr.mxu0 %v384_v0  ;;  %p358_p10 = pnand %p357_p9, %p351_p6 }
  0x3d   :  { %246 = vmatpush3.msra.mxu0 %v78_v8 }
  0xa5   :  { %v74_v10 = vpop.permute.xlu0 %73 }
  0xa6   :  { %v77_v11 = vsel %vm76_vm1, %v70_v9, %v74_v10  ;;  %v181_v26 = vpop.permute.xlu1 %180 }
  0xa7   :  { %248 = vmatmul.mubr.msk.f32.vlgmr.msra.gmra.mxu0 %vm91_vm2, %v77_v11 }
 0x167   :  { %v161_v13 = vpop.f32.mrf.mxu0 }
 0x168   :  { %v162_v14 = vadd.f32 %v225_v12, %v161_v13 }
 0x169   :  { %v249_v15 = vpop.f32.mrf.mxu0 }
 0x16a   :  { %v227_v16 = vmul.f32 -1.442695, %v162_v14 }
 0x16c   :  { %262 = vpow2.f32 %v227_v16 }
 0x16d   :  { %264 = vtanh.f32 %v162_v14 }
 0x179   :  { %v263_v17 = vpop.eup %262 }
 0x17a   :  { %v174_v18 = vadd.f32 1.0, %v263_v17  ;;  %v265_v21 = vpop.eup %264 }
 0x17c   :  { %266 = vrcp.f32 %v174_v18 }
 0x189   :  { %v267_v22 = vpop.eup %266 }
 0x18a   :  { %v177_v23 = vsel %vm169_vm5, %v265_v21, %v267_v22 }
 0x18b   :  { %185 = vrot.lane.b32.xlu0 %v177_v23, %s388_s15  ;;  %v183_v27 = vmul.f32 %v181_v26, %v177_v23 }
 0x1fd   :  { %v186_v24 = vpop.permute.xlu0 %185 }
 0x1fe   :  { %v188_v25 = vmul.f32 %v186_v24, %v177_v23 }
 0x200   :  { %190 = vrot.lane.b32.xlu1 %v188_v25, %s387_s3 }
 0x272   :  { %v191_v28 = vpop.permute.xlu1 %190 }
 0x273   :  { %v193_v29 = vadd.f32 %v191_v28, %v183_v27 }
 0x275   :  { %268 = vtanh.f32 %v193_v29 }
 0x282   :  { %v269_v30 = vpop.eup %268 }
 0x283   :  { %196 = vrot.lane.b32.xlu0 %v269_v30, %s388_s15 }
 0x2f5   :  { %v197_v31 = vpop.permute.xlu0 %196 }
 0x2f6   :  { %v199_v32 = vmul.f32 %v197_v31, %v177_v23 }
 0x2f8   :  { %201 = vrot.lane.b32.xlu1 %v199_v32, %s387_s3 }
 0x36a   :  { %v202_v33 = vpop.permute.xlu1 %201 }
 0x36b   :  { %v205_v34 = vsel %vm204_vm6, %v202_v33, %v193_v29 }
 0x36c   :  { %207 = vst.msk [vmem:[#allocation10] sm:$0xff] %vm206_vm7, %v205_v34 }
 0x36d   :  { %361 = shalt.err (!%p358_p10)
}
 0x36e   :  { %217 = dma.vmem_to_hbm [thread:$0]  %s215_s16, 128, %s446_s5, [#allocation4]  }
 0x36f   :  { %376 = dma.done.wait [#allocation4], 128  }
 0x370   :  { %377 = vsyncadd [#allocation4], 4294967168 }
 0x371   :  { %221 = vsyncpa [#allocation3], 1 }
 0x372   :  { %222 = vsyncpa [#allocation6], 1 }
 0x373   :  { %223 = vsyncpa [#allocation9], 1 }
 0x374   :  { %224 = vsyncpa [#allocation4], 1 }

</bundles_post_ra>
